<compile_context>
chip_gen: v7x
topology: tpu7x:2x2x1
jax: 0.10.0
libtpu: 0.0.40
codegen_flags: <defaults>
</compile_context>

<pallas_src>
import functools

import jax
import jax.numpy as jnp
from jax.experimental import pallas as pl
from jax.experimental.pallas import tpu as pltpu


# ---------------------------------------------------------------------------
# helpers
# ---------------------------------------------------------------------------
def _round_up(x, m):
    return (x + m - 1) // m * m


def _pad2(a, rows, cols, dtype=None):
    if dtype is not None:
        a = a.astype(dtype)
    return jnp.pad(a, ((0, rows - a.shape[0]), (0, cols - a.shape[1])))


def _seq_tile(S):
    for cand in (512, 256, 128, 64, 32, 16, 8):
        if S % cand == 0:
            return cand
    return S


# ---------------------------------------------------------------------------
# Kernel 1: hidden projection (LoRA folded) + LM head, gridded (rows x vocab)
# ---------------------------------------------------------------------------
def _lm_kernel(x_ref, weff_ref, bh_ref, wlm_ref, blm_ref,
               lm_ref, h_out_ref, h_sc):
    # Compute the hidden states once per row tile (first vocab tile only).
    @pl.when(pl.program_id(1) == 0)
    def _():
        pre = jnp.dot(x_ref[...], weff_ref[...],
                      preferred_element_type=jnp.float32)         # MXU, bf16 in
        h = jnp.tanh(pre + bh_ref[...])                           # f32 VPU/EUP
        h_bf = h.astype(h_sc.dtype)
        h_sc[...] = h_bf                                          # reuse across V tiles
        h_out_ref[...] = h_bf                                     # written back once per row tile

    # LM head for this (row tile, vocab tile).
    lm_ref[...] = (jnp.dot(h_sc[...], wlm_ref[...],
                           preferred_element_type=jnp.float32)
                   + blm_ref[...]).astype(lm_ref.dtype)


# ---------------------------------------------------------------------------
# Kernel 2: pooling ('last_token' or mean over seq) + classifier head
# ---------------------------------------------------------------------------
def _pool_clf_kernel(h_ref, wc_ref, bc_ref, clf_ref, acc_ref, *,
                     pool_mode, inv_len):
    if pool_mode == "last_token":
        # grid=(1,); the in_spec index_map already selects the final seq tile.
        pooled = h_ref[:, h_ref.shape[1] - 1, :].astype(jnp.float32)
        clf_ref[...] = (jnp.dot(pooled, wc_ref[...],
                                preferred_element_type=jnp.float32)
                        + bc_ref[...])
    else:
        s = pl.program_id(0)

        @pl.when(s == 0)
        def _():
            acc_ref[...] = jnp.zeros_like(acc_ref)

        acc_ref[...] += jnp.sum(h_ref[...].astype(jnp.float32), axis=1)

        @pl.when(s == pl.num_programs(0) - 1)
        def _():
            pooled = acc_ref[...] * inv_len
            clf_ref[...] = (jnp.dot(pooled, wc_ref[...],
                                    preferred_element_type=jnp.float32)
                            + bc_ref[...])


# ---------------------------------------------------------------------------
# Wrapper
# ---------------------------------------------------------------------------
def joint_model_forward(emb, params, *, classifier_positions="last_token"):
    """Fused JointModel forward. emb: [B, S, H] float32 -> (lm_logits, clf)."""
    B, S, H = emb.shape
    V = params["w_lm"].shape[1]
    C = params["w_c"].shape[1]

    # --- fold LoRA into the hidden weight (weights-only, done in plain JAX) ---
    w_eff = params["w_h"] + params["lora_a"] @ params["lora_b"]    # [H, H]

    # --- TPU-friendly padded shapes / tile sizes ----------------------------
    Hp = _round_up(H, 128)                    # lane-align hidden dim
    Cp = _round_up(C, 128)                    # lane-dense classifier output
    N = B * S
    TM = min(256, _round_up(N, 8))            # row tile (sublane-aligned)
    Np = _round_up(N, TM)
    Vb = _round_up(V, 128)
    TN = min(512, Vb)                         # vocab tile (lane-aligned, modest for v5e vst)
    Vp = _round_up(Vb, TN)

    # --- padded operands (bf16 for MXU inputs, f32 biases) -------------------
    x = _pad2(emb.reshape(N, H), Np, Hp, jnp.bfloat16)
    weff_p = _pad2(w_eff, Hp, Hp, jnp.bfloat16)
    bh_p = _pad2(params["b_h"], 1, Hp, jnp.float32)
    wlm_p = _pad2(params["w_lm"], Hp, Vp, jnp.bfloat16)
    blm_p = _pad2(params["b_lm"], 1, Vp, jnp.float32)
    wc_p = _pad2(params["w_c"], Hp, Cp, jnp.float32)
    bc_p = _pad2(params["b_c"], 1, Cp, jnp.float32)

    # --- cost / VMEM sizing ---------------------------------------------------
    flops = 2 * Np * Hp * Hp + 2 * Np * Hp * Vp
    bytes_accessed = (Np * Hp * 2 + Hp * Hp * 2 + Hp * 4
                      + Hp * Vp * 2 + Vp * 4
                      + Np * Vp * 4 + Np * Hp * 2)
    cost = pl.CostEstimate(flops=flops, transcendentals=Np * Hp,
                           bytes_accessed=bytes_accessed)
    blk_bytes = (2 * (TM * Hp * 2) + 2 * (Hp * Hp * 2) + 2 * (Hp * 4)
                 + 2 * (Hp * TN * 2) + 2 * (TN * 4)
                 + 2 * (TM * TN * 4) + 2 * (TM * Hp * 2) + TM * Hp * 2)
    vmem_limit = int(min(max(2 * blk_bytes, 16 * (1 << 20)), 64 * (1 << 20)))

    # --- main kernel: hidden projection + LM head ----------------------------
    lm_p, h_p = pl.pallas_call(
        _lm_kernel,
        out_shape=(jax.ShapeDtypeStruct((Np, Vp), jnp.float32),
                   jax.ShapeDtypeStruct((Np, Hp), jnp.bfloat16)),
        grid_spec=pltpu.PrefetchScalarGridSpec(
            num_scalar_prefetch=0,
            grid=(Np // TM, Vp // TN),
            in_specs=[
                pl.BlockSpec((TM, Hp), lambda i, j: (i, 0)),   # x rows
                pl.BlockSpec((Hp, Hp), lambda i, j: (0, 0)),   # W_eff (resident)
                pl.BlockSpec((1, Hp), lambda i, j: (0, 0)),    # b_h
                pl.BlockSpec((Hp, TN), lambda i, j: (0, j)),   # w_lm vocab tile
                pl.BlockSpec((1, TN), lambda i, j: (0, j)),    # b_lm vocab tile
            ],
            out_specs=(
                pl.BlockSpec((TM, TN), lambda i, j: (i, j)),   # lm logits tile
                pl.BlockSpec((TM, Hp), lambda i, j: (i, 0)),   # hidden states
            ),
            scratch_shapes=[pltpu.VMEM((TM, Hp), jnp.bfloat16)],
        ),
        compiler_params=pltpu.CompilerParams(
            dimension_semantics=("parallel", "arbitrary"),
            vmem_limit_bytes=vmem_limit),
        cost_estimate=cost,
    )(x, weff_p, bh_p, wlm_p, blm_p)

    lm_logits = lm_p[:N, :V].reshape(B, S, V)

    # --- pooling + classifier kernel -----------------------------------------
    h3 = h_p[:N].reshape(B, S, Hp)
    TS = _seq_tile(S)
    if classifier_positions == "last_token":
        grid_c = (1,)
        h_index = lambda s: (0, S // TS - 1, 0)     # only the final seq tile
    else:
        grid_c = (S // TS,)
        h_index = lambda s: (0, s, 0)

    clf_p = pl.pallas_call(
        functools.partial(_pool_clf_kernel,
                          pool_mode=classifier_positions,
                          inv_len=1.0 / S),
        out_shape=jax.ShapeDtypeStruct((B, Cp), jnp.float32),
        grid_spec=pltpu.PrefetchScalarGridSpec(
            num_scalar_prefetch=0,
            grid=grid_c,
            in_specs=[
                pl.BlockSpec((B, TS, Hp), h_index),
                pl.BlockSpec((Hp, Cp), lambda s: (0, 0)),
                pl.BlockSpec((1, Cp), lambda s: (0, 0)),
            ],
            out_specs=pl.BlockSpec((B, Cp), lambda s: (0, 0)),
            scratch_shapes=[pltpu.VMEM((B, Hp), jnp.float32)],
        ),
        compiler_params=pltpu.CompilerParams(
            dimension_semantics=("arbitrary",)),
    )(h3, wc_p, bc_p)

    clf_logits = clf_p[:, :C]
    return lm_logits, clf_logits


# ---------------------------------------------------------------------------
# references
# ---------------------------------------------------------------------------
def _reference_forward(emb, params, *, classifier_positions="last_token",
                       match_kernel_precision=True):
    B, S, H = emb.shape
    w_eff = params["w_h"] + params["lora_a"] @ params["lora_b"]
    x = emb.reshape(B * S, H)
    if match_kernel_precision:       # bf16 MXU inputs, f32 accumulation (as kernel)
        pre = jnp.dot(x.astype(jnp.bfloat16), w_eff.astype(jnp.bfloat16),
                      preferred_element_type=jnp.float32)
        h = jnp.tanh(pre + params["b_h"])
        h_bf = h.astype(jnp.bfloat16)
        lm = jnp.dot(h_bf, params["w_lm"].astype(jnp.bfloat16),
                     preferred_element_type=jnp.float32) + params["b_lm"]
        h_pool = h_bf.astype(jnp.float32)
    else:                            # pure f32 semantics of the PyTorch module
        h = jnp.tanh(x @ w_eff + params["b_h"])
        lm = h @ params["w_lm"] + params["b_lm"]
        h_pool = h
    lm = lm.reshape(B, S, -1)
    h3 = h_pool.reshape(B, S, H)
    if classifier_positions == "last_token":
        pooled = h3[:, -1, :]
    else:
        pooled = h3.mean(axis=1)
    clf = pooled @ params["w_c"] + params["b_c"]
    return lm, clf


# ---------------------------------------------------------------------------
# demo / self-test
# ---------------------------------------------------------------------------
if __name__ == "__main__":
    # Small deterministic shapes consistent with the module's forward.
    B, S, H = 2, 8, 32          # batch, seq, hidden_size
    V, C, R = 64, 8, 4          # vocab, num classes, LoRA rank

    key = jax.random.PRNGKey(0)
    ks = jax.random.split(key, 8)

    embed_table = jax.random.normal(ks[0], (V, H), jnp.float32) * 0.02
    params = {
        "w_h":    jax.random.normal(ks[1], (H, H), jnp.float32) * 0.1,
        "b_h":    jnp.zeros((1, H), jnp.float32),
        "lora_a": jax.random.normal(ks[2], (H, R), jnp.float32) * 0.05,
        "lora_b": jax.random.normal(ks[3], (R, H), jnp.float32) * 0.05,
        "w_lm":   jax.random.normal(ks[4], (H, V), jnp.float32) * 0.1,
        "b_lm":   jnp.zeros((1, V), jnp.float32),
        "w_c":    jax.random.normal(ks[5], (H, C), jnp.float32) * 0.1,
        "b_c":    jnp.zeros((1, C), jnp.float32),
    }

    input_ids = jax.random.randint(ks[6], (B, S), 0, V)
    emb = embed_table[input_ids]                     # gather is glue outside kernel

    for mode in ("last_token", "mean"):
        lm_logits, clf_logits = joint_model_forward(
            emb, params, classifier_positions=mode)
        jax.block_until_ready((lm_logits, clf_logits))
        assert lm_logits.shape == (B, S, V) and clf_logits.shape == (B, C)

        # matched-precision reference (bf16 MXU inputs, f32 accumulation)
        ref_lm, ref_clf = _reference_forward(
            emb, params, classifier_positions=mode, match_kernel_precision=True)
        assert jnp.allclose(lm_logits, ref_lm, atol=1e-3, rtol=1e-3)
        assert jnp.allclose(clf_logits, ref_clf, atol=1e-3, rtol=1e-3)

        # sanity check vs the pure-f32 PyTorch-equivalent semantics
        f32_lm, f32_clf = _reference_forward(
            emb, params, classifier_positions=mode, match_kernel_precision=False)
        assert jnp.allclose(lm_logits, f32_lm, atol=2e-2, rtol=2e-2)
        assert jnp.allclose(clf_logits, f32_clf, atol=2e-2, rtol=2e-2)

    print("KERNEL_OK")
</pallas_src>

<mosaic_0001>
module attributes {stable_mosaic.version = 11 : i64} {
  func.func @_lm_kernel(%arg0: i32, %arg1: i32, %arg2: memref<16x128xbf16, #tpu.memory_space<vmem>>, %arg3: memref<128x128xbf16, #tpu.memory_space<vmem>>, %arg4: memref<1x128xf32, #tpu.memory_space<vmem>>, %arg5: memref<128x128xbf16, #tpu.memory_space<vmem>>, %arg6: memref<1x128xf32, #tpu.memory_space<vmem>>, %arg7: memref<16x128xf32, #tpu.memory_space<vmem>>, %arg8: memref<16x128xbf16, #tpu.memory_space<vmem>>, %arg9: memref<16x128xbf16, #tpu.memory_space<vmem>>) attributes {dimension_semantics = [#tpu.dimension_semantics<parallel>, #tpu.dimension_semantics<arbitrary>], iteration_bounds = array<i64: 1, 1>, scalar_prefetch = 0 : i64, scratch_operands = 1 : i64, tpu.core_type = #tpu.core_type<tc>, window_params = [{transform_indices = @transform_0, window_bounds = array<i64: 16, 128>}, {pipeline_mode = #tpu.pipeline_mode<synchronous>, transform_indices = @transform_1, window_bounds = array<i64: 128, 128>}, {pipeline_mode = #tpu.pipeline_mode<synchronous>, transform_indices = @transform_2, window_bounds = array<i64: 1, 128>}, {transform_indices = @transform_3, window_bounds = array<i64: 128, 128>}, {transform_indices = @transform_4, window_bounds = array<i64: 1, 128>}, {transform_indices = @transform_5, window_bounds = array<i64: 16, 128>}, {transform_indices = @transform_6, window_bounds = array<i64: 16, 128>}]} {
    %c0_i32 = arith.constant 0 : i32
    %0 = arith.cmpi eq, %arg1, %c0_i32 : i32
    %1 = arith.extui %0 : i1 to i32
    %c0_i32_0 = arith.constant 0 : i32
    %2 = arith.cmpi ne, %1, %c0_i32_0 : i32
    scf.if %2 {
      %c0_8 = arith.constant 0 : index
      %c0_9 = arith.constant 0 : index
      %10 = vector.load %arg2[%c0_8, %c0_9] : memref<16x128xbf16, #tpu.memory_space<vmem>>, vector<16x128xbf16>
      %c0_10 = arith.constant 0 : index
      %c0_11 = arith.constant 0 : index
      %11 = vector.load %arg3[%c0_10, %c0_11] : memref<128x128xbf16, #tpu.memory_space<vmem>>, vector<128x128xbf16>
      %cst_12 = arith.constant dense<0.000000e+00> : vector<16x128xf32>
      %12 = tpu.matmul %10, %11, %cst_12 {dimension_numbers = #tpu.dot_dimension_numbers<[1], [0], [0], [1], [0, 0, 1, 1], [], []>} : vector<16x128xbf16>, vector<128x128xbf16>, vector<16x128xf32> -> vector<16x128xf32>
      %c0_13 = arith.constant 0 : index
      %c0_14 = arith.constant 0 : index
      %13 = vector.load %arg4[%c0_13, %c0_14] : memref<1x128xf32, #tpu.memory_space<vmem>>, vector<1x128xf32>
      %14 = vector.broadcast %13 : vector<1x128xf32> to vector<16x128xf32>
      %15 = arith.addf %12, %14 : vector<16x128xf32>
      %16 = math.tanh %15 : vector<16x128xf32>
      %17 = arith.truncf %16 : vector<16x128xf32> to vector<16x128xbf16>
      %c0_15 = arith.constant 0 : index
      %c0_16 = arith.constant 0 : index
      %18 = vector.load %arg9[%c0_15, %c0_16] : memref<16x128xbf16, #tpu.memory_space<vmem>>, vector<16x128xbf16>
      tpu.vector_store %arg9[%c0_15, %c0_16], %17 {strides = array<i32>} : memref<16x128xbf16, #tpu.memory_space<vmem>>, vector<16x128xbf16>,
      %c0_17 = arith.constant 0 : index
      %c0_18 = arith.constant 0 : index
      %19 = vector.load %arg8[%c0_17, %c0_18] : memref<16x128xbf16, #tpu.memory_space<vmem>>, vector<16x128xbf16>
      tpu.vector_store %arg8[%c0_17, %c0_18], %17 {strides = array<i32>} : memref<16x128xbf16, #tpu.memory_space<vmem>>, vector<16x128xbf16>,
    } else {
    }
    %c0 = arith.constant 0 : index
    %c0_1 = arith.constant 0 : index
    %3 = vector.load %arg9[%c0, %c0_1] : memref<16x128xbf16, #tpu.memory_space<vmem>>, vector<16x128xbf16>
    %c0_2 = arith.constant 0 : index
    %c0_3 = arith.constant 0 : index
    %4 = vector.load %arg5[%c0_2, %c0_3] : memref<128x128xbf16, #tpu.memory_space<vmem>>, vector<128x128xbf16>
    %cst = arith.constant dense<0.000000e+00> : vector<16x128xf32>
    %5 = tpu.matmul %3, %4, %cst {dimension_numbers = #tpu.dot_dimension_numbers<[1], [0], [0], [1], [0, 0, 1, 1], [], []>} : vector<16x128xbf16>, vector<128x128xbf16>, vector<16x128xf32> -> vector<16x128xf32>
    %c0_4 = arith.constant 0 : index
    %c0_5 = arith.constant 0 : index
    %6 = vector.load %arg6[%c0_4, %c0_5] : memref<1x128xf32, #tpu.memory_space<vmem>>, vector<1x128xf32>
    %7 = vector.broadcast %6 : vector<1x128xf32> to vector<16x128xf32>
    %8 = arith.addf %5, %7 : vector<16x128xf32>
    %c0_6 = arith.constant 0 : index
    %c0_7 = arith.constant 0 : index
    %9 = vector.load %arg7[%c0_6, %c0_7] : memref<16x128xf32, #tpu.memory_space<vmem>>, vector<16x128xf32>
    tpu.vector_store %arg7[%c0_6, %c0_7], %8 {strides = array<i32>} : memref<16x128xf32, #tpu.memory_space<vmem>>, vector<16x128xf32>,
    return
  }
  func.func @transform_0(%arg0: i32, %arg1: i32) -> (i32, i32) {
    %c0_i32 = arith.constant 0 : i32
    %c0_i32_0 = arith.constant 0 : i32
    return %arg0, %c0_i32 : i32, i32
  }
  func.func @transform_1(%arg0: i32, %arg1: i32) -> (i32, i32) {
    %c0_i32 = arith.constant 0 : i32
    %c0_i32_0 = arith.constant 0 : i32
    %c0_i32_1 = arith.constant 0 : i32
    return %c0_i32, %c0_i32_0 : i32, i32
  }
  func.func @transform_2(%arg0: i32, %arg1: i32) -> (i32, i32) {
    %c0_i32 = arith.constant 0 : i32
    %c0_i32_0 = arith.constant 0 : i32
    %c0_i32_1 = arith.constant 0 : i32
    return %c0_i32, %c0_i32_0 : i32, i32
  }
  func.func @transform_3(%arg0: i32, %arg1: i32) -> (i32, i32) {
    %c0_i32 = arith.constant 0 : i32
    %c0_i32_0 = arith.constant 0 : i32
    return %c0_i32, %arg1 : i32, i32
  }
  func.func @transform_4(%arg0: i32, %arg1: i32) -> (i32, i32) {
    %c0_i32 = arith.constant 0 : i32
    %c0_i32_0 = arith.constant 0 : i32
    return %c0_i32, %arg1 : i32, i32
  }
  func.func @transform_5(%arg0: i32, %arg1: i32) -> (i32, i32) {
    %c0_i32 = arith.constant 0 : i32
    return %arg0, %arg1 : i32, i32
  }
  func.func @transform_6(%arg0: i32, %arg1: i32) -> (i32, i32) {
    %c0_i32 = arith.constant 0 : i32
    %c0_i32_0 = arith.constant 0 : i32
    return %arg0, %c0_i32 : i32, i32
  }
}

</mosaic_0001>

<bundles_post_ra>
// kernel: tpu_custom_call.1
= control target key start
LH: loop header
LB: loop body
LE: loop exit
PB: predicated region body
PF: predicated region fallthrough
CT: control target
= control target key end

     0   :  { %12 = vsyncpa [#allocation4], 0  ;;  %s719_s0 = inlined_call_operand.hbm [shape: bf16[16,128], index: 0, kind: input, shape index: {}]   ;;  %s720_s1 = inlined_call_operand.hbm [shape: bf16[128,128], index: 1, kind: input, shape index: {}]   ;;  %s721_s2 = inlined_call_operand.vmem [shape: f32[1,128], index: 2, kind: input, shape index: {}]   ;;  %s722_s3 = inlined_call_operand.hbm [shape: bf16[128,128], index: 3, kind: input, shape index: {}]   ;;  %s723_s4 = inlined_call_operand.vmem [shape: f32[1,128], index: 4, kind: input, shape index: {}]   ;;  %s724_s5 = inlined_call_operand.hbm [shape: f32[16,128], index: 5, kind: output, shape index: {0}]   ;;  %s725_s6 = inlined_call_operand.hbm [shape: bf16[16,128], index: 6, kind: output, shape index: {1}]  }
   0x1   :  { %13 = vsyncpa [#allocation7], 0 }
   0x2   :  { %14 = vsyncpa [#allocation5], 0 }
   0x3   :  { %15 = vsyncpa [#allocation11], 0  ;;  %s588_s21 = smov [#allocation6]   ;;  %s589_s23 = smov [#allocation3]  }
   0x4   :  { %s33_s22 = sshll.u32 %s588_s21, 4  ;;  %s21_s24 = sshll.u32 %s589_s23, 4  ;;  %s34_s22 = int_to_ptr.vmem [resolvable:$true] %s33_s22  ;;  %s634_s24 = int_to_ptr.vmem [resolvable:$true] %s21_s24 }
   0x5   :  { %s470_s27 = scalar_lea.hbm %s720_s1, 1024 }
   0x6   :  { %p471_p0 = scmp.ne.s32.totalorder %s720_s1, %s470_s27  ;;  %p474_p1 = scmp.lt.u32.totalorder %s470_s27, %s720_s1 }
   0x8   :  { %p476_p2 = pnand %p474_p1, %p471_p0 }
   0xa   :  { %479 = shalt.err (!%p476_p2)
}
   0xb   :  { %s480_s8 = scalar_lea.vmem %s34_s22, 1024  ;;  %p485_p4 = scmp.lt.s32.totalorder %s34_s22, %s34_s22 }
   0xc   :  { %p481_p3 = scmp.ne.s32.totalorder %s34_s22, %s480_s8  ;;  %p486_p5 = scmp.lt.s32.totalorder %s480_s8, %s480_s8 }
   0xe   :  { %p487_p6 = por %p486_p5, %p485_p4 }
  0x10   :  { %p488_p7 = pnand %p487_p6, %p481_p3 }
  0x12   :  { %491 = shalt.err (!%p488_p7)
}
  0x13   :  { %s590_s9 = smov 64   ;;  %s591_s10 = smov 4  }
  0x14   :  { %39 = dma.hbm_to_vmem [thread:$0]  %s720_s1, 1024, %s34_s22, [#allocation7], %s590_s9, %s590_s9, %s591_s10  }
  0x15   :  { %s492_s15 = scalar_lea.hbm %s719_s0, 128 }
  0x16   :  { %p493_p8 = scmp.ne.s32.totalorder %s719_s0, %s492_s15  ;;  %p496_p9 = scmp.lt.u32.totalorder %s492_s15, %s719_s0 }
  0x18   :  { %p498_p10 = pnand %p496_p9, %p493_p8 }
  0x1a   :  { %501 = shalt.err (!%p498_p10)
}
  0x1b   :  { %s502_s20 = scalar_lea.vmem %s634_s24, 128  ;;  %p507_p12 = scmp.lt.s32.totalorder %s634_s24, %s634_s24 }
  0x1c   :  { %p503_p11 = scmp.ne.s32.totalorder %s634_s24, %s502_s20  ;;  %p508_p13 = scmp.lt.s32.totalorder %s502_s20, %s502_s20 }
  0x1e   :  { %p509_p0 = por %p508_p13, %p507_p12 }
  0x20   :  { %p510_p1 = pnand %p509_p0, %p503_p11 }
  0x22   :  { %513 = shalt.err (!%p510_p1)
}
  0x23   :  { %27 = dma.hbm_to_vmem [thread:$0]  %s719_s0, 128, %s634_s24, [#allocation4], %s590_s9, %s590_s9, %s591_s10  }
  0x24   :  { %s592_s22 = smov [#allocation8]   ;;  %s514_s27 = scalar_lea.hbm %s722_s3, 1024 }
  0x25   :  { %s47_s23 = sshll.u32 %s592_s22, 4  ;;  %p515_p2 = scmp.ne.s32.totalorder %s722_s3, %s514_s27  ;;  %s48_s23 = int_to_ptr.vmem [resolvable:$true] %s47_s23 }
  0x26   :  { %p518_p3 = scmp.lt.u32.totalorder %s514_s27, %s722_s3 }
  0x28   :  { %p520_p4 = pnand %p518_p3, %p515_p2 }
  0x2a   :  { %523 = shalt.err (!%p520_p4)
}
  0x2b   :  { %s524_s8 = scalar_lea.vmem %s48_s23, 1024  ;;  %p529_p6 = scmp.lt.s32.totalorder %s48_s23, %s48_s23 }
  0x2c   :  { %p525_p5 = scmp.ne.s32.totalorder %s48_s23, %s524_s8  ;;  %p530_p7 = scmp.lt.s32.totalorder %s524_s8, %s524_s8 }
  0x2e   :  { %p531_p8 = por %p530_p7, %p529_p6 }
  0x30   :  { %p532_p9 = pnand %p531_p8, %p525_p5 }
  0x32   :  { %535 = shalt.err (!%p532_p9)
}
  0x33   :  { %53 = dma.hbm_to_vmem [thread:$0]  %s722_s3, 1024, %s48_s23, [#allocation7], %s590_s9, %s590_s9, %s591_s10  }
  0x34   :  { %580 = dma.done.wait [#allocation4], 128  }
  0x35   :  { %581 = vsyncadd [#allocation4], 4294967168 }
  0x36   :  { %582 = dma.done.wait [#allocation7], 2048  }
  0x37   :  { %583 = vsyncadd [#allocation7], 4294965248  ;;  %v593_v0 = vmov 0.0   ;;  %vm594_vm0 = vmmov 0   ;;  %v449_v1 = vld [vmem:[#allocation6] sm:$0xff]   ;;  %v450_v2 = vld [vmem:[#allocation6 + $0x8] sm:$0xff]  }
  0x38   :  { %398 = vmatprep.subr.bf16.mxu0 %v593_v0  ;;  %414 = vmatprep.mubr.msk.bf16.mxu0 %vm594_vm0, %v593_v0  ;;  %v451_v3 = vld [vmem:[#allocation6 + $0x10] sm:$0xff]   ;;  %v458_v4 = vld [vmem:[#allocation8] sm:$0xff]   ;;  %v452_v5 = vld [vmem:[#allocation6 + $0x18] sm:$0xff]   ;;  %s595_s12 = smov [#allocation10]  }
  0x39   :  { %418 = vmatprep.subr.bf16.mxu1 %v593_v0  ;;  %434 = vmatprep.mubr.msk.bf16.mxu1 %vm594_vm0, %v593_v0  ;;  %v459_v6 = vld [vmem:[#allocation8 + $0x8] sm:$0xff]   ;;  %v453_v7 = vld [vmem:[#allocation6 + $0x20] sm:$0xff]   ;;  %v460_v8 = vld [vmem:[#allocation8 + $0x10] sm:$0xff]   ;;  %s335_s13 = sshll.u32 %s595_s12, 4  ;;  %s336_s13 = int_to_ptr.vmem [resolvable:$true] %s335_s13 }
  0x3a   :  { %399 = vmatpush3.bf16.msra.mxu0 %v449_v1  ;;  %419 = vmatpush3.bf16.msra.mxu1 %v458_v4  ;;  %v454_v9 = vld [vmem:[#allocation6 + $0x28] sm:$0xff]   ;;  %v461_v10 = vld [vmem:[#allocation8 + $0x18] sm:$0xff]   ;;  %v455_v11 = vld [vmem:[#allocation6 + $0x30] sm:$0xff]   ;;  %s536_s14 = scalar_lea.vmem %s336_s13, 128  ;;  %p541_p11 = scmp.lt.s32.totalorder %s336_s13, %s336_s13 }
  0x3b   :  { %400 = vmatprep.subr.bf16.mxu0 %v593_v0  ;;  %420 = vmatprep.subr.bf16.mxu1 %v593_v0  ;;  %v456_v12 = vld [vmem:[#allocation6 + $0x38] sm:$0xff]   ;;  %v462_v14 = vld [vmem:[#allocation8 + $0x20] sm:$0xff]   ;;  %v463_v15 = vld [vmem:[#allocation8 + $0x28] sm:$0xff]   ;;  %p537_p10 = scmp.ne.s32.totalorder %s336_s13, %s536_s14  ;;  %p542_p12 = scmp.lt.s32.totalorder %s536_s14, %s536_s14 }
  0x3c   :  { %v457_v13 = vld [vmem:[#allocation3] sm:$0xff]   ;;  %v464_v16 = vld [vmem:[#allocation8 + $0x30] sm:$0xff]  }
  0x3d   :  { %v465_v17 = vld [vmem:[#allocation8 + $0x38] sm:$0xff]   ;;  %p543_p13 = por %p542_p12, %p541_p11 }
  0x3e   :  { %401 = vmatpush3.bf16.msra.mxu0 %v450_v2  ;;  %421 = vmatpush3.bf16.msra.mxu1 %v459_v6  ;;  %v352_v18 = vld [vmem:[%s721_s2] ss:$0 sm:$0xff] }
  0x3f   :  { %402 = vmatprep.subr.bf16.mxu0 %v593_v0  ;;  %422 = vmatprep.subr.bf16.mxu1 %v593_v0  ;;  %p544_p0 = pnand %p543_p13, %p537_p10 }
  0x42   :  { %403 = vmatpush3.bf16.msra.mxu0 %v451_v3  ;;  %423 = vmatpush3.bf16.msra.mxu1 %v460_v8 }
  0x43   :  { %404 = vmatprep.subr.bf16.mxu0 %v593_v0  ;;  %424 = vmatprep.subr.bf16.mxu1 %v593_v0 }
  0x46   :  { %405 = vmatpush3.bf16.msra.mxu0 %v452_v5  ;;  %425 = vmatpush3.bf16.msra.mxu1 %v461_v10 }
  0x47   :  { %406 = vmatprep.subr.bf16.mxu0 %v593_v0  ;;  %426 = vmatprep.subr.bf16.mxu1 %v593_v0 }
  0x4a   :  { %407 = vmatpush3.bf16.msra.mxu0 %v453_v7  ;;  %427 = vmatpush3.bf16.msra.mxu1 %v462_v14 }
  0x4b   :  { %408 = vmatprep.subr.bf16.mxu0 %v593_v0  ;;  %428 = vmatprep.subr.bf16.mxu1 %v593_v0 }
  0x4e   :  { %409 = vmatpush3.bf16.msra.mxu0 %v454_v9  ;;  %429 = vmatpush3.bf16.msra.mxu1 %v463_v15 }
  0x4f   :  { %410 = vmatprep.subr.bf16.mxu0 %v593_v0  ;;  %430 = vmatprep.subr.bf16.mxu1 %v593_v0 }
  0x52   :  { %411 = vmatpush3.bf16.msra.mxu0 %v455_v11  ;;  %431 = vmatpush3.bf16.msra.mxu1 %v464_v16 }
  0x53   :  { %412 = vmatprep.subr.bf16.mxu0 %v593_v0  ;;  %432 = vmatprep.subr.bf16.mxu1 %v593_v0 }
  0x56   :  { %413 = vmatpush3.bf16.msra.mxu0 %v456_v12  ;;  %433 = vmatpush3.bf16.msra.mxu1 %v465_v17 }
  0x59   :  { %415 = vmatmul.mubr.bf16.vlgmr.msra.gmra.mrb[0].mxu0 %v457_v13 }
 0x12c   :  { %v183_v19 = vpop.f32.mrb[0].mxu0 }
 0x12d   :  { %v184_v20 = vadd.f32 %v352_v18, %v183_v19  ;;  %v416_v21 = vpop.f32.mrb[1].mxu0 }
 0x12e   :  { %v186_v22 = vpop.f32.mrb[2].mxu0 }
 0x12f   :  { %v187_v23 = vadd.f32 %v352_v18, %v186_v22  ;;  %v417_v24 = vpop.f32.mrb[3].mxu0  ;;  %466 = vtanh.f32 %v184_v20 }
 0x131   :  { %468 = vtanh.f32 %v187_v23 }
 0x139   :  { %v467_v25 = vpop.eup %466 }
 0x13b   :  { %v469_v26 = vpop.eup %468 }
 0x13c   :  { %v192_v27 = vpack.c.bf16 %v469_v26, %v467_v25 }
 0x13e   :  { %435 = vmatmul.mubr.bf16.vlgmr.msra.gmra.mrb[0].mxu1 %v192_v27  ;;  %379 = vst [vmem:[#allocation10] sm:$0xff] %v192_v27  }
 0x13f   :  { %547 = shalt.err (!%p544_p0)
}
 0x140   :  { %s548_s16 = scalar_lea.hbm %s725_s6, 128 }
 0x141   :  { %p549_p1 = scmp.ne.s32.totalorder %s725_s6, %s548_s16  ;;  %p552_p2 = scmp.lt.u32.totalorder %s548_s16, %s725_s6 }
 0x143   :  { %p554_p3 = pnand %p552_p2, %p549_p1 }
 0x145   :  { %557 = shalt.err (!%p554_p3)
}
 0x146   :  { %341 = dma.vmem_to_hbm [thread:$0]  %s336_s13, 128, %s725_s6, [#allocation11], %s590_s9, %s590_s9, %s591_s10  }
 0x147   :  { %v364_v28 = vld [vmem:[%s723_s4] ss:$0 sm:$0xff]  ;;  %s596_s25 = smov [#allocation9]  }
 0x148   :  { %s323_s26 = sshll.u32 %s596_s25, 4  ;;  %s324_s26 = int_to_ptr.vmem [resolvable:$true] %s323_s26 }
 0x149   :  { %s558_s27 = scalar_lea.vmem %s324_s26, 256  ;;  %p563_p5 = scmp.lt.s32.totalorder %s324_s26, %s324_s26 }
 0x14a   :  { %p559_p4 = scmp.ne.s32.totalorder %s324_s26, %s558_s27  ;;  %p564_p6 = scmp.lt.s32.totalorder %s558_s27, %s558_s27 }
 0x14c   :  { %p565_p7 = por %p564_p6, %p563_p5 }
 0x14e   :  { %p566_p8 = pnand %p565_p7, %p559_p4 }
 0x211   :  { %v309_v29 = vpop.f32.mrb[0].mxu1 }
 0x212   :  { %v310_v30 = vadd.f32 %v364_v28, %v309_v29  ;;  %v436_v31 = vpop.f32.mrb[1].mxu1 }
 0x213   :  { %v312_v32 = vpop.f32.mrb[2].mxu1 }
 0x214   :  { %316 = vst [vmem:[#allocation9] sm:$0xff] %v310_v30  ;;  %v313_v33 = vadd.f32 %v364_v28, %v312_v32  ;;  %v437_v34 = vpop.f32.mrb[3].mxu1 }
 0x216   :  { %317 = vst [vmem:[#allocation9 + $0x8] sm:$0xff] %v313_v33 }
 0x217   :  { %569 = shalt.err (!%p566_p8)
}
 0x218   :  { %s570_s9 = scalar_lea.hbm %s724_s5, 256 }
 0x219   :  { %p571_p9 = scmp.ne.s32.totalorder %s724_s5, %s570_s9  ;;  %p574_p10 = scmp.lt.u32.totalorder %s570_s9, %s724_s5 }
 0x21b   :  { %p576_p11 = pnand %p574_p10, %p571_p9 }
 0x21d   :  { %579 = shalt.err (!%p576_p11)
}
 0x21e   :  { %s597_s7 = smov 128   ;;  %s598_s8 = smov 8  }
 0x21f   :  { %329 = dma.vmem_to_hbm [thread:$0]  %s324_s26, 256, %s724_s5, [#allocation5], %s597_s7, %s597_s7, %s598_s8  }
 0x220   :  { %584 = dma.done.wait [#allocation5], 256  }
 0x221   :  { %585 = vsyncadd [#allocation5], 4294967040 }
 0x222   :  { %586 = dma.done.wait [#allocation11], 128  }
 0x223   :  { %587 = vsyncadd [#allocation11], 4294967168 }
 0x224   :  { %348 = vsyncpa [#allocation4], 1 }
 0x225   :  { %349 = vsyncpa [#allocation7], 1 }
 0x226   :  { %350 = vsyncpa [#allocation5], 1 }
 0x227   :  { %351 = vsyncpa [#allocation11], 1 }

</bundles_post_ra>
